<compile_context>
chip_gen: v7x
topology: tpu7x:2x2x1
jax: 0.10.0
libtpu: 0.0.40
codegen_flags: <defaults>
</compile_context>

<pallas_src>
from functools import partial

import jax
import jax.numpy as jnp
import numpy as np
from jax.experimental import pallas as pl
from jax.experimental.pallas import tpu as pltpu


# --------------------------------------------------------------------------
# Kernel
# --------------------------------------------------------------------------
def _afms_kernel(x_ref, w_ref, b_ref, alpha_ref, out_ref, *, inv_t):
    # x_ref / out_ref: (NB, C, Tp)   Tp = T padded to a multiple of 128
    # w_ref:           (C, C)        fc weight (out_features, in_features)
    # b_ref:           (1, C)        fc bias (row layout, lane-dense)
    # alpha_ref:       (C, 1)        learned alpha
    #
    # Pass 1: channel means for the whole batch tile in one fused reduce over
    # the lane (T) axis.  inv_t is 1 / T_original, so zero padding of T does
    # not change the mean.
    means = jnp.sum(x_ref[...].astype(jnp.float32), axis=2) * inv_t   # (NB, C)

    # One batched fc for all NB batch elements: contract means' C axis with
    # w's in-features axis (dim 1 of both) -> (NB, C).  No explicit weight
    # transpose is materialized.
    logits = jax.lax.dot_general(
        means, w_ref[...], (((1,), (1,)), ((), ())),
        preferred_element_type=jnp.float32) + b_ref[...]
    gates = jax.nn.sigmoid(logits)[:, :, None]                        # (NB,C,1)

    # Pass 2: whole-block (x + alpha) * gate with lane-dense stores.  x is
    # re-read through the ref so the pass-1 value is not live across the
    # matmul (short per-vreg live ranges even for multi-MiB blocks).
    out_ref[...] = ((x_ref[...] + alpha_ref[...][None]) * gates).astype(
        out_ref.dtype)


# --------------------------------------------------------------------------
# Generation-aware sizing helpers
# --------------------------------------------------------------------------
def _hw_params():
    """Best-effort TPU-generation query.

    Returns (block_budget_bytes, vmem_limit_cap_bytes, num_parallel_cores).
    Falls back to values that are safe on every generation.
    """
    budget, vmem_cap, cores = 4 << 20, 48 << 20, 1   # safe-everywhere default
    kind = ""
    try:
        kind = jax.devices()[0].device_kind.lower()
    except Exception:
        pass
    phys_vmem = None
    try:
        phys_vmem = int(getattr(pltpu.get_tpu_info(), "vmem_capacity_bytes"))
    except Exception:
        pass

    if "v7" in kind or (phys_vmem is not None and phys_vmem <= (64 << 20)):
        # v7x: 64 MiB VMEM per TC, 3.2 TB/s HBM, 2 TensorCores per chip.
        budget, vmem_cap, cores = 8 << 20, 48 << 20, 2
    elif "v6" in kind:
        # v6e: 128 MiB VMEM, ~1.4 TB/s HBM, single TC -> big blocks pay off.
        budget, vmem_cap, cores = 16 << 20, 96 << 20, 1
    elif "v5" in kind:
        # v5e: 128 MiB VMEM but only ~0.82 TB/s HBM; modest blocks saturate.
        budget, vmem_cap, cores = 4 << 20, 64 << 20, 1
    elif phys_vmem is not None:
        vmem_cap = min(phys_vmem * 3 // 4, 96 << 20)
        budget = max(4 << 20, min(vmem_cap // 8, 16 << 20))
    return budget, vmem_cap, cores


def _pick_batch_tile(batch, bytes_per_batch_elem, budget_bytes, num_cores=1):
    """Pick the batch tile NB.

    * Largest NB whose x block fits `budget_bytes`.
    * On multi-TensorCore chips (v7x), keep at least `num_cores` grid steps
      (and round the step count up to a multiple of `num_cores` for balance)
      so the "parallel" batch axis feeds both cores.
    * Uses a cdiv grid, so NB need not divide B (partial last block is masked
      by Pallas) -- prime batch sizes no longer fall back to NB=1.
    """
    max_nb = max(1, min(batch, int(budget_bytes // max(bytes_per_batch_elem, 1))))
    steps = pl.cdiv(batch, max_nb)
    if num_cores > 1 and batch >= num_cores:
        steps = max(steps, num_cores)
        rem = steps % num_cores
        if rem:
            steps += num_cores - rem
        steps = min(steps, batch)
    return int(pl.cdiv(batch, steps))


# --------------------------------------------------------------------------
# Wrapper
# --------------------------------------------------------------------------
def afms_forward(x, w, b, alpha, *, block_budget_bytes=None):
    """x: (B, C, T); w: (C, C) fc weight; b: (C,) or (C, 1); alpha: (C,) or (C, 1)."""
    B, C, T = x.shape
    itemsize = jnp.dtype(x.dtype).itemsize

    # Lane-dense output stores: pad T up to a multiple of 128 (zero padding
    # keeps the T-sum, hence the gate, unchanged since we divide by the
    # original T); slice the tail off afterwards.
    t_pad = int(pl.cdiv(T, 128)) * 128 if T % 128 else T
    xp = x if t_pad == T else jnp.pad(x, ((0, 0), (0, 0), (0, t_pad - T)))

    b2d = jnp.reshape(b, (1, C)).astype(w.dtype)
    alpha2d = jnp.reshape(alpha, (C, 1)).astype(x.dtype)

    gen_budget, vmem_cap, num_cores = _hw_params()
    if block_budget_bytes is None:
        block_budget_bytes = gen_budget

    param_itemsize = jnp.dtype(w.dtype).itemsize
    param_bytes = (C * C + 2 * C) * param_itemsize
    # Single-buffer the constant-index-map params once they stop being
    # negligible; default double-buffering of a large (C, C) weight would eat
    # VMEM better spent on a bigger x block.
    param_single = param_bytes >= (1 << 20)
    param_bufs = 1 if param_single else 2

    # Keep 4 * block (in + out, each double-buffered) + params + margin under
    # the generation cap.
    margin = 4 << 20
    block_budget = min(
        block_budget_bytes,
        max((vmem_cap - param_bufs * param_bytes - margin) // 4, 256 << 10))

    nb = _pick_batch_tile(B, C * t_pad * itemsize, block_budget, num_cores)
    grid = (int(pl.cdiv(B, nb)),)

    block_bytes = nb * C * t_pad * itemsize
    needed = 4 * block_bytes + param_bufs * param_bytes + margin
    vmem_limit = int(min(max(needed, 32 << 20), vmem_cap))

    param_kwargs = dict(pipeline_mode=pl.Buffered(1)) if param_single else {}
    in_specs = [
        pl.BlockSpec((nb, C, t_pad), lambda i: (i, 0, 0)),
        pl.BlockSpec((C, C), lambda i: (0, 0), **param_kwargs),
        pl.BlockSpec((1, C), lambda i: (0, 0), **param_kwargs),
        pl.BlockSpec((C, 1), lambda i: (0, 0), **param_kwargs),
    ]

    cost = pl.CostEstimate(
        flops=3 * B * C * T + 2 * B * C * C,
        transcendentals=B * C,
        bytes_accessed=2 * B * C * T * itemsize + C * C * param_itemsize,
    )

    out = pl.pallas_call(
        partial(_afms_kernel, inv_t=1.0 / float(T)),
        out_shape=jax.ShapeDtypeStruct((B, C, t_pad), x.dtype),
        grid_spec=pltpu.PrefetchScalarGridSpec(
            num_scalar_prefetch=0,
            grid=grid,
            in_specs=in_specs,
            out_specs=pl.BlockSpec((nb, C, t_pad), lambda i: (i, 0, 0)),
        ),
        compiler_params=pltpu.CompilerParams(
            dimension_semantics=("parallel",),
            vmem_limit_bytes=vmem_limit,
        ),
        cost_estimate=cost,
    )(xp, w, b2d, alpha2d)

    return out if t_pad == T else out[:, :, :T]


# --------------------------------------------------------------------------
# Reference & test
# --------------------------------------------------------------------------
def afms_reference(x, w, b, alpha):
    y = jnp.mean(x, axis=2)                                  # (B, C)
    y = jax.nn.sigmoid(y @ w.T + jnp.reshape(b, (-1,)))      # (B, C)
    return (x + jnp.reshape(alpha, (1, -1, 1))) * y[:, :, None]


def _run_case(keys, B, C, T, **fwd_kwargs):
    x = jax.random.normal(keys[0], (B, C, T), dtype=jnp.float32)
    bound = 1.0 / np.sqrt(C)
    w = jax.random.uniform(keys[1], (C, C), minval=-bound, maxval=bound,
                           dtype=jnp.float32)
    b = jax.random.uniform(keys[2], (C, 1), minval=-bound, maxval=bound,
                           dtype=jnp.float32)
    alpha = jnp.ones((C, 1), dtype=jnp.float32)   # AFMS init: ones((C, 1))
    out = jax.block_until_ready(afms_forward(x, w, b, alpha, **fwd_kwargs))
    ref = afms_reference(x, w, b, alpha)
    np.testing.assert_allclose(np.asarray(out), np.asarray(ref),
                               rtol=1e-4, atol=1e-5)


if __name__ == "__main__":
    key = jax.random.PRNGKey(0)
    keys = jax.random.split(key, 9)

    # 1) TPU-friendly shapes: T multiple of 128, C multiple of 8.
    _run_case(keys[0:3], B=4, C=64, T=256)

    # 2) Tiny, non-128-aligned T: exercises the wrapper pad/slice path.
    _run_case(keys[3:6], B=2, C=16, T=48)

    # 3) Prime batch with a small forced block budget: exercises the cdiv
    #    grid with a masked partial last batch block (NB does not divide B).
    _run_case(keys[6:9], B=5, C=32, T=128,
              block_budget_bytes=3 * 32 * 128 * 4)

    print("KERNEL_OK")
</pallas_src>

<mosaic_0001>
module attributes {stable_mosaic.version = 11 : i64} {
  func.func @_afms_kernel(%arg0: i32, %arg1: memref<4x64x256xf32, #tpu.memory_space<vmem>>, %arg2: memref<64x64xf32, #tpu.memory_space<vmem>>, %arg3: memref<1x64xf32, #tpu.memory_space<vmem>>, %arg4: memref<64x1xf32, #tpu.memory_space<vmem>>, %arg5: memref<4x64x256xf32, #tpu.memory_space<vmem>>) attributes {dimension_semantics = [#tpu.dimension_semantics<parallel>], iteration_bounds = array<i64: 1>, scalar_prefetch = 0 : i64, scratch_operands = 0 : i64, tpu.core_type = #tpu.core_type<tc>, window_params = [{transform_indices = @transform_0, window_bounds = array<i64: 4, 64, 256>}, {pipeline_mode = #tpu.pipeline_mode<synchronous>, transform_indices = @transform_1, window_bounds = array<i64: 64, 64>}, {pipeline_mode = #tpu.pipeline_mode<synchronous>, transform_indices = @transform_2, window_bounds = array<i64: 1, 64>}, {pipeline_mode = #tpu.pipeline_mode<synchronous>, transform_indices = @transform_3, window_bounds = array<i64: 64, 1>}, {transform_indices = @transform_4, window_bounds = array<i64: 4, 64, 256>}]} {
    %c0 = arith.constant 0 : index
    %c0_0 = arith.constant 0 : index
    %c0_1 = arith.constant 0 : index
    %0 = vector.load %arg1[%c0, %c0_0, %c0_1] : memref<4x64x256xf32, #tpu.memory_space<vmem>>, vector<4x64x256xf32>
    %cst = arith.constant dense<0.000000e+00> : vector<4x64xf32>
    %1 = vector.multi_reduction <add>, %0, %cst [2] : vector<4x64x256xf32> to vector<4x64xf32>
    %cst_2 = arith.constant 3.906250e-03 : f32
    %2 = vector.broadcast %cst_2 : f32 to vector<4x64xf32>
    %3 = arith.mulf %1, %2 : vector<4x64xf32>
    %c0_3 = arith.constant 0 : index
    %c0_4 = arith.constant 0 : index
    %4 = vector.load %arg2[%c0_3, %c0_4] : memref<64x64xf32, #tpu.memory_space<vmem>>, vector<64x64xf32>
    %cst_5 = arith.constant dense<0.000000e+00> : vector<4x64xf32>
    %5 = tpu.matmul %3, %4, %cst_5 {dimension_numbers = #tpu.dot_dimension_numbers<[1], [1], [0], [0], [0, 0, 1, 0], [], []>} : vector<4x64xf32>, vector<64x64xf32>, vector<4x64xf32> -> vector<4x64xf32>
    %c0_6 = arith.constant 0 : index
    %c0_7 = arith.constant 0 : index
    %6 = vector.load %arg3[%c0_6, %c0_7] : memref<1x64xf32, #tpu.memory_space<vmem>>, vector<1x64xf32>
    %7 = vector.broadcast %6 : vector<1x64xf32> to vector<4x64xf32>
    %8 = arith.addf %5, %7 : vector<4x64xf32>
    %9 = arith.negf %8 : vector<4x64xf32>
    %10 = math.exp %9 : vector<4x64xf32>
    %cst_8 = arith.constant 1.000000e+00 : f32
    %11 = vector.broadcast %cst_8 : f32 to vector<4x64xf32>
    %12 = arith.addf %11, %10 : vector<4x64xf32>
    %13 = arith.divf %11, %12 : vector<4x64xf32>
    %14 = vector.shape_cast %13 : vector<4x64xf32> to vector<4x64x1xf32>
    %c0_9 = arith.constant 0 : index
    %c0_10 = arith.constant 0 : index
    %c0_11 = arith.constant 0 : index
    %15 = vector.load %arg1[%c0_9, %c0_10, %c0_11] : memref<4x64x256xf32, #tpu.memory_space<vmem>>, vector<4x64x256xf32>
    %c0_12 = arith.constant 0 : index
    %c0_13 = arith.constant 0 : index
    %16 = vector.load %arg4[%c0_12, %c0_13] : memref<64x1xf32, #tpu.memory_space<vmem>>, vector<64x1xf32>
    %17 = vector.shape_cast %16 : vector<64x1xf32> to vector<1x64x1xf32>
    %18 = vector.broadcast %17 : vector<1x64x1xf32> to vector<4x64x256xf32>
    %19 = arith.addf %15, %18 : vector<4x64x256xf32>
    %20 = vector.broadcast %14 : vector<4x64x1xf32> to vector<4x64x256xf32>
    %21 = arith.mulf %19, %20 : vector<4x64x256xf32>
    %c0_14 = arith.constant 0 : index
    %c0_15 = arith.constant 0 : index
    %c0_16 = arith.constant 0 : index
    %22 = vector.load %arg5[%c0_14, %c0_15, %c0_16] : memref<4x64x256xf32, #tpu.memory_space<vmem>>, vector<4x64x256xf32>
    tpu.vector_store %arg5[%c0_14, %c0_15, %c0_16], %21 {strides = array<i32>} : memref<4x64x256xf32, #tpu.memory_space<vmem>>, vector<4x64x256xf32>,
    return
  }
  func.func @transform_0(%arg0: i32) -> (i32, i32, i32) {
    %c0_i32 = arith.constant 0 : i32
    %c0_i32_0 = arith.constant 0 : i32
    %c0_i32_1 = arith.constant 0 : i32
    return %arg0, %c0_i32, %c0_i32_0 : i32, i32, i32
  }
  func.func @transform_1(%arg0: i32) -> (i32, i32) {
    %c0_i32 = arith.constant 0 : i32
    %c0_i32_0 = arith.constant 0 : i32
    %c0_i32_1 = arith.constant 0 : i32
    return %c0_i32, %c0_i32_0 : i32, i32
  }
  func.func @transform_2(%arg0: i32) -> (i32, i32) {
    %c0_i32 = arith.constant 0 : i32
    %c0_i32_0 = arith.constant 0 : i32
    %c0_i32_1 = arith.constant 0 : i32
    return %c0_i32, %c0_i32_0 : i32, i32
  }
  func.func @transform_3(%arg0: i32) -> (i32, i32) {
    %c0_i32 = arith.constant 0 : i32
    %c0_i32_0 = arith.constant 0 : i32
    %c0_i32_1 = arith.constant 0 : i32
    return %c0_i32, %c0_i32_0 : i32, i32
  }
  func.func @transform_4(%arg0: i32) -> (i32, i32, i32) {
    %c0_i32 = arith.constant 0 : i32
    %c0_i32_0 = arith.constant 0 : i32
    %c0_i32_1 = arith.constant 0 : i32
    return %arg0, %c0_i32, %c0_i32_0 : i32, i32, i32
  }
}

</mosaic_0001>

<bundles_post_ra>
// kernel: tpu_custom_call.1
= control target key start
LH: loop header
LB: loop body
LE: loop exit
PB: predicated region body
PF: predicated region fallthrough
CT: control target
= control target key end

     0   :  { %9 = vsyncpa [#allocation3], 0  ;;  %s1635_s0 = inlined_call_operand.hbm [shape: f32[4,64,256], index: 0, kind: input, shape index: {}]   ;;  %s1636_s1 = inlined_call_operand.vmem [shape: f32[64,64], index: 1, kind: input, shape index: {}]   ;;  %s1637_s2 = inlined_call_operand.vmem [shape: f32[1,64], index: 2, kind: input, shape index: {}]   ;;  %s1638_s3 = inlined_call_operand.vmem [shape: f32[64,1], index: 3, kind: input, shape index: {}]   ;;  %s1639_s4 = inlined_call_operand.hbm [shape: f32[4,64,256], index: 4, kind: output, shape index: {}]  }
   0x1   :  { %10 = vsyncpa [#allocation4], 0  ;;  %s1068_s15 = smov [#allocation2]   ;;  %s1020_s19 = scalar_lea.hbm %s1635_s0, 8192 }
   0x2   :  { %s16_s16 = sshll.u32 %s1068_s15, 4  ;;  %p1021_p0 = scmp.ne.s32.totalorder %s1635_s0, %s1020_s19  ;;  %s17_s16 = int_to_ptr.vmem [resolvable:$true] %s16_s16 }
   0x3   :  { %p1024_p1 = scmp.lt.u32.totalorder %s1020_s19, %s1635_s0 }
   0x5   :  { %p1026_p2 = pnand %p1024_p1, %p1021_p0 }
   0x7   :  { %1029 = shalt.err (!%p1026_p2)
}
   0x8   :  { %s1030_s24 = scalar_lea.vmem %s17_s16, 8192  ;;  %p1035_p4 = scmp.lt.s32.totalorder %s17_s16, %s17_s16 }
   0x9   :  { %p1031_p3 = scmp.ne.s32.totalorder %s17_s16, %s1030_s24  ;;  %p1036_p5 = scmp.lt.s32.totalorder %s1030_s24, %s1030_s24 }
   0xb   :  { %p1037_p6 = por %p1036_p5, %p1035_p4 }
   0xd   :  { %p1038_p7 = pnand %p1037_p6, %p1031_p3 }
   0xf   :  { %1041 = shalt.err (!%p1038_p7)
}
  0x10   :  { %s1069_s25 = smov 256   ;;  %s1070_s26 = smov 16  }
  0x11   :  { %22 = dma.hbm_to_vmem [thread:$0]  %s1635_s0, 8192, %s17_s16, [#allocation3], %s1069_s25, %s1069_s25, %s1070_s26  }
  0x12   :  { %1064 = dma.done.wait [#allocation3], 8192  }
  0x13   :  { %1065 = vsyncadd [#allocation3], 4294959104  ;;  %v1116_v0 = vld [vmem:[#allocation2 + $0x80] sm:$0xff]  ;;  %v1118_v1 = vld [vmem:[#allocation2 + $0x88] sm:$0xff]  ;;  %vm449_vm0 = vcmask 523264   ;;  %vm1072_vm2 = vmmov 0  }
  0x14   :  { %v1120_v2 = vld [vmem:[#allocation2] sm:$0xff]  ;;  %v120_v3 = vadd.f32 %v1118_v1, %v1116_v0  ;;  %v1124_v4 = vld [vmem:[#allocation2 + $0x8] sm:$0xff]  ;;  %v1126_v5 = vld [vmem:[#allocation2 + $0x90] sm:$0xff]  ;;  %vm282_vm3 = vcmask 130112   ;;  %vm289_vm4 = vcmask 195712   ;;  %vm296_vm5 = vcmask 261312  }
  0x15   :  { %1683 = vst [vmem:[#allocation8_spill] sm:$0xff] %v1126_v5  ;;  %v1128_v6 = vld [vmem:[#allocation2 + $0x98] sm:$0xff]  ;;  %v96_v7 = vadd.f32 %v1124_v4, %v1120_v2  ;;  %v1132_v8 = vld [vmem:[#allocation2 + $0x10] sm:$0xff]  ;;  %v1140_v12 = vld [vmem:[#allocation2 + $0xa0] sm:$0xff]  ;;  %vm303_vm6 = vcmask 326912   ;;  %vm310_vm7 = vcmask 392512  }
  0x16   :  { %1684 = vst [vmem:[#allocation9_spill] sm:$0xff] %v1128_v6  ;;  %v1134_v9 = vld [vmem:[#allocation2 + $0x18] sm:$0xff]  ;;  %121 = vadd.xlane.f32.xlu1 %v120_v3  ;;  %v123_v10 = vadd.f32 %v1128_v6, %v1126_v5  ;;  %v1142_v13 = vld [vmem:[#allocation2 + $0xa8] sm:$0xff]  ;;  %v1144_v14 = vld [vmem:[#allocation2 + $0x20] sm:$0xff]  ;;  %vm317_vm8 = vcmask 458112   ;;  %vm324_vm9 = vcmask 523712  }
  0x17   :  { %97 = vadd.xlane.f32.xlu0 %v96_v7  ;;  %v99_v11 = vadd.f32 %v1134_v9, %v1132_v8  ;;  %1685 = vst [vmem:[#allocation10_spill] sm:$0xff] %v1142_v13  ;;  %v1146_v15 = vld [vmem:[#allocation2 + $0x28] sm:$0xff]  ;;  %v126_v16 = vadd.f32 %v1142_v13, %v1140_v12  ;;  %v1152_v18 = vld [vmem:[#allocation2 + $0x110] sm:$0xff]  ;;  %v1154_v19 = vld [vmem:[#allocation2 + $0x118] sm:$0xff]  ;;  %vm443_vm10 = vcmask 1041409   ;;  %vm445_vm11 = vcmask 1042434  }
  0x18   :  { %v102_v17 = vadd.f32 %v1146_v15, %v1144_v14  ;;  %1686 = vst [vmem:[#allocation11_spill] sm:$0xff] %v1152_v18  ;;  %1687 = vst [vmem:[#allocation12_spill] sm:$0xff] %v1154_v19  ;;  %v1156_v20 = vld [vmem:[#allocation2 + $0x100] sm:$0xff]  ;;  %v1158_v21 = vld [vmem:[#allocation2 + $0x108] sm:$0xff]  ;;  %v147_v22 = vadd.f32 %v1154_v19, %v1152_v18  ;;  %vm447_vm12 = vcmask 1043459  }
  0x19   :  { %1688 = vst [vmem:[#allocation13_spill] sm:$0xff] %v1156_v20  ;;  %1689 = vst [vmem:[#allocation14_spill] sm:$0xff] %v1158_v21  ;;  %v144_v23 = vadd.f32 %v1158_v21, %v1156_v20  ;;  %v1164_v24 = vld [vmem:[#allocation2 + $0xb0] sm:$0xff]  ;;  %v1166_v25 = vld [vmem:[#allocation2 + $0xb8] sm:$0xff] }
  0x1a   :  { %124 = vadd.xlane.f32.xlu1 %v123_v10  ;;  %1690 = vst [vmem:[#allocation15_spill] sm:$0xff] %v1164_v24  ;;  %1691 = vst [vmem:[#allocation16_spill] sm:$0xff] %v1166_v25  ;;  %v1168_v26 = vld [vmem:[#allocation2 + $0x30] sm:$0xff]  ;;  %v1170_v27 = vld [vmem:[#allocation2 + $0x38] sm:$0xff]  ;;  %v129_v28 = vadd.f32 %v1166_v25, %v1164_v24 }
  0x1b   :  { %100 = vadd.xlane.f32.xlu0 %v99_v11  ;;  %v105_v29 = vadd.f32 %v1170_v27, %v1168_v26  ;;  %v80_v30 = vld [vmem:[#allocation2 + $0x180] sm:$0xff]  ;;  %v81_v31 = vld [vmem:[#allocation2 + $0x188] sm:$0xff]  ;;  %v1186_v38 = vld [vmem:[#allocation2 + $0x190] sm:$0xff] }
  0x1c   :  { %v1176_v32 = vld [vmem:[#allocation2 + $0x120] sm:$0xff]  ;;  %v1178_v33 = vld [vmem:[#allocation2 + $0x128] sm:$0xff]  ;;  %v168_v34 = vadd.f32 %v81_v31, %v80_v30  ;;  %1694 = vst [vmem:[#allocation19_spill] sm:$0xff] %v1186_v38  ;;  %v1188_v39 = vld [vmem:[#allocation2 + $0x198] sm:$0xff] }
  0x1d   :  { %1692 = vst [vmem:[#allocation17_spill] sm:$0xff] %v1176_v32  ;;  %1693 = vst [vmem:[#allocation18_spill] sm:$0xff] %v1178_v33  ;;  %v150_v35 = vadd.f32 %v1178_v33, %v1176_v32  ;;  %v1182_v36 = vld [vmem:[#allocation2 + $0x40] sm:$0xff]  ;;  %v1184_v37 = vld [vmem:[#allocation2 + $0x48] sm:$0xff]  ;;  %v171_v41 = vadd.f32 %v1188_v39, %v1186_v38 }
  0x1e   :  { %127 = vadd.xlane.f32.xlu1 %v126_v16  ;;  %1695 = vst [vmem:[#allocation20_spill] sm:$0xff] %v1188_v39  ;;  %v108_v40 = vadd.f32 %v1184_v37, %v1182_v36  ;;  %v1194_v42 = vld [vmem:[#allocation2 + $0x130] sm:$0xff]  ;;  %v1196_v43 = vld [vmem:[#allocation2 + $0x138] sm:$0xff]  ;;  %v1198_v44 = vld [vmem:[#allocation2 + $0xc0] sm:$0xff] }
  0x1f   :  { %103 = vadd.xlane.f32.xlu0 %v102_v17  ;;  %1696 = vst [vmem:[#allocation21_spill] sm:$0xff] %v1194_v42  ;;  %1697 = vst [vmem:[#allocation22_spill] sm:$0xff] %v1196_v43  ;;  %v1200_v45 = vld [vmem:[#allocation2 + $0xc8] sm:$0xff]  ;;  %v153_v46 = vadd.f32 %v1196_v43, %v1194_v42  ;;  %v1206_v48 = vld [vmem:[#allocation2 + $0x50] sm:$0xff] }
  0x20   :  { %1698 = vst [vmem:[#allocation23_spill] sm:$0xff] %v1198_v44  ;;  %1699 = vst [vmem:[#allocation24_spill] sm:$0xff] %v1200_v45  ;;  %v132_v47 = vadd.f32 %v1200_v45, %v1198_v44  ;;  %v1208_v49 = vld [vmem:[#allocation2 + $0x58] sm:$0xff]  ;;  %v1210_v50 = vld [vmem:[#allocation2 + $0x1a0] sm:$0xff] }
  0x21   :  { %1700 = vst [vmem:[#allocation25_spill] sm:$0xff] %v1210_v50  ;;  %v1212_v51 = vld [vmem:[#allocation2 + $0x1a8] sm:$0xff]  ;;  %v111_v52 = vadd.f32 %v1208_v49, %v1206_v48  ;;  %v1218_v54 = vld [vmem:[#allocation2 + $0x140] sm:$0xff]  ;;  %v1222_v56 = vld [vmem:[#allocation2 + $0xd0] sm:$0xff] }
  0x22   :  { %148 = vadd.xlane.f32.xlu1 %v147_v22  ;;  %1701 = vst [vmem:[#allocation26_spill] sm:$0xff] %v1212_v51  ;;  %v174_v53 = vadd.f32 %v1212_v51, %v1210_v50  ;;  %1702 = vst [vmem:[#allocation27_spill] sm:$0xff] %v1218_v54  ;;  %v1220_v55 = vld [vmem:[#allocation2 + $0x148] sm:$0xff]  ;;  %v1224_v57 = vld [vmem:[#allocation2 + $0xd8] sm:$0xff] }
  0x23   :  { %145 = vadd.xlane.f32.xlu0 %v144_v23  ;;  %1703 = vst [vmem:[#allocation28_spill] sm:$0xff] %v1220_v55  ;;  %1704 = vst [vmem:[#allocation29_spill] sm:$0xff] %v1222_v56  ;;  %v156_v58 = vadd.f32 %v1220_v55, %v1218_v54  ;;  %v135_v59 = vadd.f32 %v1224_v57, %v1222_v56  ;;  %v1230_v60 = vld [vmem:[#allocation2 + $0x60] sm:$0xff]  ;;  %v1232_v61 = vld [vmem:[#allocation2 + $0x68] sm:$0xff] }
  0x24   :  { %1705 = vst [vmem:[#allocation30_spill] sm:$0xff] %v1224_v57  ;;  %v1234_v62 = vld [vmem:[#allocation2 + $0x1b0] sm:$0xff]  ;;  %v1236_v63 = vld [vmem:[#allocation2 + $0x1b8] sm:$0xff]  ;;  %v114_v3 = vadd.f32 %v1232_v61, %v1230_v60  ;;  %v1246_v16 = vld [vmem:[#allocation2 + $0xe0] sm:$0xff] }
  0x25   :  { %1706 = vst [vmem:[#allocation31_spill] sm:$0xff] %v1234_v62  ;;  %1707 = vst [vmem:[#allocation32_spill] sm:$0xff] %v1236_v63  ;;  %v177_v7 = vadd.f32 %v1236_v63, %v1234_v62  ;;  %v1242_v10 = vld [vmem:[#allocation2 + $0x150] sm:$0xff]  ;;  %v1244_v11 = vld [vmem:[#allocation2 + $0x158] sm:$0xff] }
  0x26   :  { %130 = vadd.xlane.f32.xlu1 %v129_v28  ;;  %1708 = vst [vmem:[#allocation33_spill] sm:$0xff] %v1242_v10  ;;  %1709 = vst [vmem:[#allocation34_spill] sm:$0xff] %v1244_v11  ;;  %v1248_v17 = vld [vmem:[#allocation2 + $0xe8] sm:$0xff]  ;;  %v159_v22 = vadd.f32 %v1244_v11, %v1242_v10  ;;  %v1254_v28 = vld [vmem:[#allocation2 + $0x70] sm:$0xff] }
  0x27   :  { %106 = vadd.xlane.f32.xlu0 %v105_v29  ;;  %1710 = vst [vmem:[#allocation35_spill] sm:$0xff] %v1246_v16  ;;  %1711 = vst [vmem:[#allocation36_spill] sm:$0xff] %v1248_v17  ;;  %v138_v23 = vadd.f32 %v1248_v17, %v1246_v16  ;;  %v1256_v29 = vld [vmem:[#allocation2 + $0x78] sm:$0xff]  ;;  %v1258_v30 = vld [vmem:[#allocation2 + $0x1c0] sm:$0xff] }
  0x28   :  { %1712 = vst [vmem:[#allocation37_spill] sm:$0xff] %v1258_v30  ;;  %v1260_v31 = vld [vmem:[#allocation2 + $0x1c8] sm:$0xff]  ;;  %vm1294_vm1 = vmpackc.low %vm449_vm0, %vm449_vm0  ;;  %v1306_v63 = vld [vmem:[#allocation2 + $0x1f8] sm:$0xff] }
  0x29   :  { %1713 = vst [vmem:[#allocation38_spill] sm:$0xff] %v1260_v31  ;;  %1725 = vst [vmem:[#allocation48_spill] sm:$0xff] %v1306_v63  ;;  %v1308_v62 = vld [vmem:[#allocation2 + $0x1e0] sm:$0xff]  ;;  %v1310_v51 = vld [vmem:[#allocation2 + $0x1e8] sm:$0xff] }
  0x2a   :  { %169 = vadd.xlane.f32.xlu1 %v168_v34  ;;  %v117_v34 = vadd.f32 %v1256_v29, %v1254_v28  ;;  %1726 = vst [vmem:[#allocation49_spill] sm:$0xff] %v1308_v62  ;;  %1727 = vst [vmem:[#allocation50_spill] sm:$0xff] %v1310_v51 }
  0x2b   :  { %151 = vadd.xlane.f32.xlu0 %v150_v35  ;;  %v180_v35 = vadd.f32 %v1260_v31, %v1258_v30  ;;  %v1071_v31 = vmov 0.0|0.0   ;;  %v694_v30 = vld [vmem:[%s1638_s3 + $0x10] sm:$0xff] }
  0x2c   :  { %988 = vmatprep.subr.bf16.mxu0 %v1071_v31 }
  0x2e   :  { %109 = vadd.xlane.f32.xlu1 %v108_v40  ;;  %v1266_v40 = vld [vmem:[#allocation2 + $0x160] sm:$0xff] }
  0x2f   :  { %172 = vadd.xlane.f32.xlu0 %v171_v41  ;;  %1714 = vst [vmem:[#allocation39_spill] sm:$0xff] %v1266_v40  ;;  %v1268_v41 = vld [vmem:[#allocation2 + $0x168] sm:$0xff] }
  0x30   :  { %1715 = vst [vmem:[#allocation40_spill] sm:$0xff] %v1268_v41 }
  0x32   :  { %154 = vadd.xlane.f32.xlu1 %v153_v46  ;;  %v1270_v46 = vld [vmem:[#allocation2 + $0xf0] sm:$0xff] }
  0x33   :  { %133 = vadd.xlane.f32.xlu0 %v132_v47  ;;  %1716 = vst [vmem:[#allocation41_spill] sm:$0xff] %v1270_v46  ;;  %v1272_v47 = vld [vmem:[#allocation2 + $0xf8] sm:$0xff] }
  0x34   :  { %1717 = vst [vmem:[#allocation42_spill] sm:$0xff] %v1272_v47 }
  0x36   :  { %112 = vadd.xlane.f32.xlu1 %v111_v52  ;;  %v162_v52 = vadd.f32 %v1268_v41, %v1266_v40 }
  0x37   :  { %175 = vadd.xlane.f32.xlu0 %v174_v53  ;;  %v224_v53 = vld [vmem:[%s1636_s1] sm:$0xff] }
  0x3a   :  { %157 = vadd.xlane.f32.xlu1 %v156_v58  ;;  %v225_v58 = vld [vmem:[%s1636_s1 + $0x8] sm:$0xff] }
  0x3b   :  { %136 = vadd.xlane.f32.xlu0 %v135_v59  ;;  %v141_v59 = vadd.f32 %v1272_v47, %v1270_v46 }
  0x3e   :  { %115 = vadd.xlane.f32.xlu1 %v114_v3  ;;  %v1284_v3 = vld [vmem:[#allocation2 + $0x170] sm:$0xff] }
  0x3f   :  { %178 = vadd.xlane.f32.xlu0 %v177_v7  ;;  %1718 = vst [vmem:[#allocation43_spill] sm:$0xff] %v1284_v3  ;;  %v1286_v7 = vld [vmem:[#allocation2 + $0x178] sm:$0xff] }
  0x40   :  { %1719 = vst [vmem:[#allocation44_spill] sm:$0xff] %v1286_v7 }
  0x42   :  { %160 = vadd.xlane.f32.xlu1 %v159_v22  ;;  %v989_v22 = vpack.c.bf16 %v225_v58, %v224_v53  ;;  %v1304_v58 = vld [vmem:[#allocation2 + $0x1f0] sm:$0xff] }
  0x43   :  { %139 = vadd.xlane.f32.xlu0 %v138_v23  ;;  %v1288_v23 = vld [vmem:[#allocation2 + $0x1d0] sm:$0xff]  ;;  %1724 = vst [vmem:[#allocation47_spill] sm:$0xff] %v1304_v58 }
  0x44   :  { %1720 = vst [vmem:[#allocation45_spill] sm:$0xff] %v1288_v23  ;;  %991 = vmatpush3.bf16.xpose.msk.msra.mxu0 %vm1294_vm1, %v989_v22  ;;  %v226_v22 = vld [vmem:[%s1636_s1 + $0x10] sm:$0xff] }
  0x45   :  { %992 = vmatprep.subr.bf16.mxu0 %v1071_v31 }
  0x46   :  { %118 = vadd.xlane.f32.xlu1 %v117_v34  ;;  %v1290_v34 = vld [vmem:[#allocation2 + $0x1d8] sm:$0xff] }
  0x47   :  { %181 = vadd.xlane.f32.xlu0 %v180_v35  ;;  %1721 = vst [vmem:[#allocation46_spill] sm:$0xff] %v1290_v34  ;;  %v165_v35 = vadd.f32 %v1286_v7, %v1284_v3  ;;  %v183_v53 = vadd.f32 %v1290_v34, %v1288_v23  ;;  %v186_v34 = vadd.f32 %v1310_v51, %v1308_v62  ;;  %v271_v7 = vlaneseq }
  0x49   :  { %v1362_v11 = vshrl.u32 %v271_v7, 7 }
  0x4a   :  { %163 = vadd.xlane.f32.xlu1 %v162_v52  ;;  %v189_v52 = vadd.f32 %v1306_v63, %v1304_v58  ;;  %v229_v63 = vld [vmem:[%s1636_s1 + $0x28] sm:$0xff] }
  0x4b   :  { %142 = vadd.xlane.f32.xlu0 %v141_v59  ;;  %v227_v59 = vld [vmem:[%s1636_s1 + $0x18] sm:$0xff] }
  0x4c   :  { %v993_v23 = vpack.c.bf16 %v227_v59, %v226_v22  ;;  %v695_v22 = vld [vmem:[%s1638_s3 + $0x18] sm:$0xff]  ;;  %v697_v59 = vld [vmem:[%s1638_s3 + $0x28] sm:$0xff] }
  0x4e   :  { %166 = vadd.xlane.f32.xlu1 %v165_v35  ;;  %995 = vmatpush3.bf16.xpose.msk.msra.mxu0 %vm1294_vm1, %v993_v23  ;;  %v228_v35 = vld [vmem:[%s1636_s1 + $0x20] sm:$0xff]  ;;  %v230_v23 = vld [vmem:[%s1636_s1 + $0x30] sm:$0xff] }
  0x4f   :  { %184 = vadd.xlane.f32.xlu0 %v183_v53  ;;  %996 = vmatprep.subr.bf16.mxu0 %v1071_v31  ;;  %v997_v58 = vpack.c.bf16 %v229_v63, %v228_v35  ;;  %v692_v63 = vld [vmem:[%s1638_s3] sm:$0xff]  ;;  %v699_v35 = vld [vmem:[%s1638_s3 + $0x38] sm:$0xff] }
  0x52   :  { %190 = vadd.xlane.f32.xlu1 %v189_v52  ;;  %v1073_v52 = vmov 0.0  }
  0x53   :  { %187 = vadd.xlane.f32.xlu0 %v186_v34  ;;  %v231_v34 = vld [vmem:[%s1636_s1 + $0x38] sm:$0xff]  ;;  %985 = vmatprep.mubr.msk.f32.mxu0 %vm1072_vm2, %v1073_v52 }
  0x54   :  { %v1001_v53 = vpack.c.bf16 %v231_v34, %v230_v23 }
  0x56   :  { %999 = vmatpush3.bf16.xpose.msk.msra.mxu0 %vm1294_vm1, %v997_v58  ;;  %v693_v58 = vld [vmem:[%s1638_s3 + $0x8] sm:$0xff] }
  0x57   :  { %1000 = vmatprep.subr.bf16.mxu0 %v1071_v31  ;;  %v1074_v31 = vmov 0  }
  0x58   :  { %1012 = vset.pattern.permute.xlu1 %v1074_v31  ;;  %1013 = vset.pattern.permute.xlu0 %v1074_v31 }
  0x5e   :  { %1003 = vmatpush3.bf16.xpose.msk.msra.mxu0 %vm1294_vm1, %v1001_v53 }
  0x63   :  { %702 = vperm.xlu1 %1012, %v692_v63  }
  0x67   :  { %712 = vperm.xlu1 %1012, %v694_v30  }
  0x69   :  { %707 = vperm.xlu0 %1013, %v693_v58  }
  0x6b   :  { %717 = vperm.xlu1 %1012, %v695_v22  }
  0x6f   :  { %727 = vperm.xlu1 %1012, %v697_v59  }
  0x73   :  { %737 = vperm.xlu1 %1012, %v699_v35   ;;  %v272_v35 = vand.u32 127, %v271_v7 }
  0x75   :  { %v277_v10 = vadd.s32 4294967288, %v272_v35  ;;  %v284_v55 = vadd.s32 4294967280, %v272_v35  ;;  %v291_v43 = vadd.s32 4294967272, %v272_v35  ;;  %v298_v42 = vadd.s32 4294967264, %v272_v35 }
  0x76   :  { %v1369_v32 = vsub.s32 %v272_v35, %v1362_v11  ;;  %v305_v7 = vadd.s32 4294967256, %v272_v35  ;;  %v312_v21 = vadd.s32 4294967248, %v272_v35 }
  0x77   :  { %v1372_v19 = vsub.s32 %v277_v10, %v1362_v11  ;;  %v1375_v18 = vsub.s32 %v284_v55, %v1362_v11  ;;  %v1380_v46 = vsub.s32 %v291_v43, %v1362_v11  ;;  %v1383_v17 = vsub.s32 %v298_v42, %v1362_v11 }
  0x78   :  { %v1391_v43 = vsub.s32 %v312_v21, %v1362_v11 }
  0xa3   :  { %v122_v23 = vpop.xlane.xlu1 %121 }
  0xa4   :  { %v98_v34 = vpop.xlane.xlu0 %97  ;;  %v200_v10 = vmul.f32 0.00390625, %v122_v23 }
  0xa5   :  { %v192_v44 = vmul.f32 0.00390625, %v98_v34 }
  0xa7   :  { %v125_v53 = vpop.xlane.xlu1 %124 }
  0xa8   :  { %v101_v52 = vpop.xlane.xlu0 %100  ;;  %v201_v47 = vmul.f32 0.00390625, %v125_v53  ;;  %v1388_v53 = vsub.s32 %v305_v7, %v1362_v11 }
  0xa9   :  { %v193_v57 = vmul.f32 0.00390625, %v101_v52 }
  0xaa   :  { %v333_v5 = vrot.slane %v201_v47, %v1372_v19 }
  0xab   :  { %v128_v63 = vpop.xlane.xlu1 %127 }
  0xac   :  { %v104_v31 = vpop.xlane.xlu0 %103  ;;  %v202_v56 = vmul.f32 0.00390625, %v128_v63  ;;  %v319_v63 = vadd.s32 4294967240, %v272_v35 }
  0xad   :  { %v194_v55 = vmul.f32 0.00390625, %v104_v31  ;;  %v329_v31 = vrot.slane %v200_v10, %v1369_v32 }
  0xaf   :  { %v149_v58 = vpop.xlane.xlu1 %148 }
  0xb0   :  { %v146_v30 = vpop.xlane.xlu0 %145  ;;  %v209_v25 = vmul.f32 0.00390625, %v149_v58  ;;  %v281_v58 = vrot.slane %v193_v57, %v1372_v19  ;;  %v334_v57 = vsel %vm282_vm3, %v333_v5, %v329_v31 }
  0xb1   :  { %v208_v24 = vmul.f32 0.00390625, %v146_v30  ;;  %v288_v30 = vrot.slane %v194_v55, %v1375_v18 }
  0xb3   :  { %v131_v51 = vpop.xlane.xlu1 %130  ;;  %v368_v21 = vrot.slane %v208_v24, %v1369_v32 }
  0xb4   :  { %v107_v22 = vpop.xlane.xlu0 %106  ;;  %v203_v45 = vmul.f32 0.00390625, %v131_v51  ;;  %v338_v51 = vrot.slane %v202_v56, %v1375_v18 }
  0xb5   :  { %v195_v6 = vmul.f32 0.00390625, %v107_v22  ;;  %v372_v22 = vrot.slane %v209_v25, %v1372_v19 }
  0xb6   :  { %v343_v7 = vrot.slane %v203_v45, %v1380_v46  ;;  %v339_v45 = vsel %vm289_vm4, %v338_v51, %v334_v57 }
  0xb7   :  { %v170_v62 = vpop.xlane.xlu1 %169 }
  0xb8   :  { %v152_v50 = vpop.xlane.xlu0 %151  ;;  %v216_v47 = vmul.f32 0.00390625, %v170_v62  ;;  %v344_v5 = vsel %vm296_vm5, %v343_v7, %v339_v45 }
  0xb9   :  { %v210_v13 = vmul.f32 0.00390625, %v152_v50  ;;  %v276_v50 = vrot.slane %v192_v44, %v1369_v32 }
  0xbb   :  { %v110_v39 = vpop.xlane.xlu1 %109  ;;  %v283_v24 = vsel %vm282_vm3, %v281_v58, %v276_v50 }
  0xbc   :  { %v173_v38 = vpop.xlane.xlu0 %172  ;;  %v196_v23 = vmul.f32 0.00390625, %v110_v39  ;;  %v295_v39 = vrot.slane %v195_v6, %v1380_v46  ;;  %v1410_v6 = vsub.s32 %v319_v63, %v1362_v11  ;;  %v290_v62 = vsel %vm289_vm4, %v288_v30, %v283_v24 }
  0xbd   :  { %v217_v34 = vmul.f32 0.00390625, %v173_v38  ;;  %v377_v38 = vrot.slane %v210_v13, %v1375_v18 }
  0xbe   :  { %v302_v56 = vrot.slane %v196_v23, %v1383_v17  ;;  %v407_v23 = vrot.slane %v216_v47, %v1369_v32 }
  0xbf   :  { %v155_v59 = vpop.xlane.xlu1 %154  ;;  %v411_v44 = vrot.slane %v217_v34, %v1372_v19 }
  0xc0   :  { %v134_v3 = vpop.xlane.xlu0 %133  ;;  %v211_v35 = vmul.f32 0.00390625, %v155_v59  ;;  %v373_v59 = vsel %vm282_vm3, %v372_v22, %v368_v21 }
  0xc1   :  { %v204_v55 = vmul.f32 0.00390625, %v134_v3  ;;  %v297_v3 = vsel %vm296_vm5, %v295_v39, %v290_v62  ;;  %v378_v63 = vsel %vm289_vm4, %v377_v38, %v373_v59 }
  0xc2   :  { %v382_v31 = vrot.slane %v211_v35, %v1380_v46  ;;  %v304_v51 = vsel %vm303_vm6, %v302_v56, %v297_v3 }
  0xc3   :  { %v1358_v41 = vpop.xlane.xlu1 %112  ;;  %v348_v34 = vrot.slane %v204_v55, %v1383_v17 }
  0xc4   :  { %v1360_v40 = vpop.xlane.xlu0 %175  ;;  %v197_v13 = vmul.f32 0.00390625, %v1358_v41  ;;  %v412_v41 = vsel %vm282_vm3, %v411_v44, %v407_v23  ;;  %v383_v35 = vsel %vm296_vm5, %v382_v31, %v378_v63 }
  0xc5   :  { %v218_v21 = vmul.f32 0.00390625, %v1360_v40  ;;  %v349_v40 = vsel %vm303_vm6, %v348_v34, %v344_v5 }
  0xc7   :  { %v1364_v54 = vpop.xlane.xlu1 %157 }
  0xc8   :  { %v1366_v33 = vpop.xlane.xlu0 %136  ;;  %v212_v58 = vmul.f32 0.00390625, %v1364_v54  ;;  %v309_v54 = vrot.slane %v197_v13, %v1388_v53 }
  0xc9   :  { %v205_v30 = vmul.f32 0.00390625, %v1366_v33 }
  0xca   :  { %v387_v33 = vrot.slane %v212_v58, %v1383_v17  ;;  %v311_v59 = vsel %vm310_vm7, %v309_v54, %v304_v51 }
  0xcb   :  { %v1377_v20 = vpop.xlane.xlu1 %115 }
  0xcc   :  { %v1385_v16 = vpop.xlane.xlu0 %178  ;;  %v198_v57 = vmul.f32 0.00390625, %v1377_v20  ;;  %v388_v13 = vsel %vm303_vm6, %v387_v33, %v383_v35 }
  0xcd   :  { %v219_v50 = vmul.f32 0.00390625, %v1385_v16  ;;  %v416_v16 = vrot.slane %v218_v21, %v1375_v18 }
  0xcf   :  { %v161_v42 = vpop.xlane.xlu1 %160  ;;  %v421_v20 = vrot.slane %v219_v50, %v1380_v46  ;;  %v417_v51 = vsel %vm289_vm4, %v416_v16, %v412_v41 }
  0xd0   :  { %v140_v52 = vpop.xlane.xlu0 %139  ;;  %v213_v32 = vmul.f32 0.00390625, %v161_v42  ;;  %v353_v42 = vrot.slane %v205_v30, %v1388_v53 }
  0xd1   :  { %v206_v7 = vmul.f32 0.00390625, %v140_v52 }
  0xd2   :  { %v392_v45 = vrot.slane %v213_v32, %v1388_v53  ;;  %v354_v31 = vsel %vm310_vm7, %v353_v42, %v349_v40  ;;  %v949_v40 = vld [vmem:[%s1637_s2] ss:$0 sm:$0xff]  ;;  %s1075_s2 = smov [#allocation5]  }
  0xd3   :  { %v119_v10 = vpop.xlane.xlu1 %118  ;;  %v358_v44 = vrot.slane %v206_v7, %v1391_v43 }
  0xd4   :  { %v182_v25 = vpop.xlane.xlu0 %181  ;;  %v199_v52 = vmul.f32 0.00390625, %v119_v10  ;;  %v316_v10 = vrot.slane %v198_v57, %v1391_v43  ;;  %v393_v34 = vsel %vm310_vm7, %v392_v45, %v388_v13 }
  0xd5   :  { %v220_v38 = vmul.f32 0.00390625, %v182_v25  ;;  %v359_v30 = vsel %vm317_vm8, %v358_v44, %v354_v31  ;;  %v554_v44 = vsub.s32 0, %v1362_v11 }
  0xd6   :  { %v323_v58 = vrot.slane %v199_v52, %v1410_v6  ;;  %v318_v54 = vsel %vm317_vm8, %v316_v10, %v311_v59  ;;  %v659_v10 = vsub.s32 3, %v1362_v11 }
  0xd7   :  { %v164_v19 = vpop.xlane.xlu1 %163  ;;  %v426_v3 = vrot.slane %v220_v38, %v1383_v17  ;;  %v422_v17 = vsel %vm296_vm5, %v421_v20, %v417_v51  ;;  %v589_v20 = vsub.s32 1, %v1362_v11 }
  0xd8   :  { %v143_v22 = vpop.xlane.xlu0 %142  ;;  %v214_v39 = vmul.f32 0.00390625, %v164_v19 }
  0xd9   :  { %v207_v47 = vmul.f32 0.00390625, %v143_v22 }
  0xda   :  { %v397_v25 = vrot.slane %v214_v39, %v1391_v43  ;;  %v325_v39 = vsel %vm324_vm9, %v323_v58, %v318_v54 }
  0xdb   :  { %v167_v56 = vpop.xlane.xlu1 %166  ;;  %v363_v5 = vrot.slane %v207_v47, %v1410_v6 }
  0xdc   :  { %v215_v55 = vmul.f32 0.00390625, %v167_v56  ;;  %v185_v24 = vpop.xlane.xlu0 %184  ;;  %v398_v21 = vsel %vm317_vm8, %v397_v25, %v393_v34  ;;  %v698_v56 = vld [vmem:[%s1638_s3 + $0x30] sm:$0xff] }
  0xdd   :  { %v221_v62 = vmul.f32 0.00390625, %v185_v24  ;;  %v364_v32 = vsel %vm324_vm9, %v363_v5, %v359_v30  ;;  %v624_v5 = vsub.s32 2, %v1362_v11 }
  0xde   :  { %v402_v18 = vrot.slane %v215_v55, %v1410_v6  ;;  %v444_v33 = vsel %vm443_vm10, %v364_v32, %v325_v39 }
  0xdf   :  { %v191_v23 = vpop.xlane.xlu1 %190  ;;  %v431_v19 = vrot.slane %v221_v62, %v1388_v53  ;;  %v427_v53 = vsel %vm303_vm6, %v426_v3, %v422_v17 }
  0xe0   :  { %v188_v46 = vpop.xlane.xlu0 %187  ;;  %v223_v63 = vmul.f32 0.00390625, %v191_v23  ;;  %v403_v50 = vsel %vm324_vm9, %v402_v18, %v398_v21 }
  0xe1   :  { %v222_v22 = vmul.f32 0.00390625, %v188_v46  ;;  %v432_v47 = vsel %vm310_vm7, %v431_v19, %v427_v53 }
  0xe2   :  { %v441_v7 = vrot.slane %v223_v63, %v1410_v6  ;;  %v446_v6 = vsel %vm445_vm11, %v403_v50, %v444_v33 }
  0xe3   :  { %v436_v41 = vrot.slane %v222_v22, %v1391_v43  ;;  %v696_v43 = vld [vmem:[%s1638_s3 + $0x20] sm:$0xff]  ;;  %v1478_v18 = vpop.permute.xlu1 %702  ;;  %s937_s3 = sshll.u32 %s1075_s2, 4  ;;  %s938_s3 = int_to_ptr.vmem [resolvable:$true] %s937_s3 }
  0xe4   :  { %722 = vperm.xlu0 %1013, %v696_v43   ;;  %v740_v30 = vadd.f32 %v1478_v18, %v1120_v2  ;;  %v741_v22 = vadd.f32 %v1478_v18, %v1124_v4  ;;  %s1042_s10 = scalar_lea.vmem %s938_s3, 8192  ;;  %p1047_p9 = scmp.lt.s32.totalorder %s938_s3, %s938_s3 }
  0xe5   :  { %v437_v35 = vsel %vm317_vm8, %v436_v41, %v432_v47  ;;  %p1043_p8 = scmp.ne.s32.totalorder %s938_s3, %s1042_s10  ;;  %p1048_p10 = scmp.lt.s32.totalorder %s1042_s10, %s1042_s10 }
  0xe6   :  { %v442_v57 = vsel %vm324_vm9, %v441_v7, %v437_v35 }
  0xe7   :  { %v448_v38 = vsel %vm447_vm12, %v442_v57, %v446_v6  ;;  %v1480_v23 = vpop.permute.xlu1 %712  ;;  %p1049_p11 = por %p1048_p10, %p1047_p9 }
  0xe8   :  { %986 = vmatmul.mubr.msk.f32.vlgmr.msra.gmra.mrb[0].mxu0 %vm449_vm0, %v448_v38  ;;  %732 = vperm.xlu0 %1013, %v698_v56   ;;  %v1484_v58 = vpop.permute.xlu0 %707 }
  0xe9   :  { %v742_v51 = vadd.f32 %v1484_v58, %v1132_v8  ;;  %v743_v34 = vadd.f32 %v1484_v58, %v1134_v9  ;;  %v744_v8 = vadd.f32 %v1480_v23, %v1144_v14  ;;  %v745_v9 = vadd.f32 %v1480_v23, %v1146_v15  ;;  %p1050_p12 = pnand %p1049_p11, %p1043_p8 }
  0xeb   :  { %v1482_v31 = vpop.permute.xlu1 %717 }
  0xec   :  { %v746_v14 = vadd.f32 %v1482_v31, %v1168_v26  ;;  %v747_v15 = vadd.f32 %v1482_v31, %v1170_v27 }
  0xef   :  { %v1486_v11 = vpop.permute.xlu1 %727 }
  0xf0   :  { %v750_v26 = vadd.f32 %v1486_v11, %v1206_v48  ;;  %v751_v27 = vadd.f32 %v1486_v11, %v1208_v49 }
  0xf3   :  { %v1490_v46 = vpop.permute.xlu1 %737 }
  0xf4   :  { %v754_v48 = vadd.f32 %v1490_v46, %v1254_v28  ;;  %v755_v49 = vadd.f32 %v1490_v46, %v1256_v29  ;;  %v1729_v28 = vld [vmem:[#allocation8_spill] sm:$0xff]  ;;  %v1730_v29 = vld [vmem:[#allocation9_spill] sm:$0xff] }
 0x163   :  { %v1488_v19 = vpop.permute.xlu0 %722 }
 0x164   :  { %v748_v2 = vadd.f32 %v1488_v19, %v1182_v36  ;;  %v749_v4 = vadd.f32 %v1488_v19, %v1184_v37 }
 0x167   :  { %v1492_v63 = vpop.permute.xlu0 %732 }
 0x168   :  { %v752_v36 = vadd.f32 %v1492_v63, %v1230_v60  ;;  %v753_v37 = vadd.f32 %v1492_v63, %v1232_v61  ;;  %v756_v60 = vadd.f32 %v1478_v18, %v1116_v0  ;;  %v757_v61 = vadd.f32 %v1478_v18, %v1118_v1  ;;  %v1728_v1 = vld [vmem:[#allocation10_spill] sm:$0xff] }
 0x169   :  { %v760_v0 = vadd.f32 %v1480_v23, %v1140_v12  ;;  %v1731_v12 = vld [vmem:[#allocation23_spill] sm:$0xff] }
 0x1bb   :  { %v542_v42 = vpop.f32.mrb[0].mxu0 }
 0x1bc   :  { %v543_v52 = vadd.f32 %v949_v40, %v542_v42  ;;  %v987_v55 = vpop.f32.mrb[1].mxu0 }
 0x1be   :  { %v959_v24 = vmul.f32 -1.442695, %v543_v52 }
 0x1c0   :  { %1014 = vpow2.f32 %v959_v24 }
 0x1ca   :  { %v1015_v16 = vpop.eup %1014 }
 0x1cb   :  { %v549_v45 = vadd.f32 1.0, %v1015_v16 }
 0x1cd   :  { %1016 = vrcp.f32 %v549_v45 }
 0x1d7   :  { %v1017_v62 = vpop.eup %1016 }
 0x1d8   :  { %v555_v59 = vrot.slane %v1017_v62, %v554_v44  ;;  %v590_v25 = vrot.slane %v1017_v62, %v589_v20  ;;  %v625_v13 = vrot.slane %v1017_v62, %v624_v5  ;;  %v660_v3 = vrot.slane %v1017_v62, %v659_v10 }
 0x1d9   :  { %v761_v44 = vadd.f32 %v1480_v23, %v1728_v1  ;;  %v758_v10 = vadd.f32 %v1484_v58, %v1729_v28  ;;  %v1744_v1 = vld [vmem:[#allocation12_spill] sm:$0xff]  ;;  %v1745_v28 = vld [vmem:[#allocation17_spill] sm:$0xff] }
 0x1da   :  { %561 = vbcast.lane.b32.xlu1 %v555_v59, 264  ;;  %557 = vbcast.lane.b32.xlu0 %v555_v59, 256 }
 0x1de   :  { %565 = vbcast.lane.b32.xlu1 %v555_v59, 272  ;;  %573 = vbcast.lane.b32.xlu0 %v555_v59, 288 }
 0x1e2   :  { %569 = vbcast.lane.b32.xlu1 %v555_v59, 280  ;;  %581 = vbcast.lane.b32.xlu0 %v555_v59, 304 }
 0x1e6   :  { %577 = vbcast.lane.b32.xlu1 %v555_v59, 296  ;;  %592 = vbcast.lane.b32.xlu0 %v590_v25, 256 }
 0x1ea   :  { %585 = vbcast.lane.b32.xlu1 %v555_v59, 312  ;;  %600 = vbcast.lane.b32.xlu0 %v590_v25, 272 }
 0x1ee   :  { %596 = vbcast.lane.b32.xlu1 %v590_v25, 264  ;;  %608 = vbcast.lane.b32.xlu0 %v590_v25, 288 }
 0x1f2   :  { %604 = vbcast.lane.b32.xlu1 %v590_v25, 280  ;;  %612 = vbcast.lane.b32.xlu0 %v590_v25, 296 }
 0x1f6   :  { %616 = vbcast.lane.b32.xlu1 %v590_v25, 304  ;;  %620 = vbcast.lane.b32.xlu0 %v590_v25, 312 }
 0x1fa   :  { %627 = vbcast.lane.b32.xlu1 %v625_v13, 256  ;;  %631 = vbcast.lane.b32.xlu0 %v625_v13, 264 }
 0x1fe   :  { %635 = vbcast.lane.b32.xlu1 %v625_v13, 272  ;;  %639 = vbcast.lane.b32.xlu0 %v625_v13, 280 }
 0x202   :  { %643 = vbcast.lane.b32.xlu1 %v625_v13, 288  ;;  %647 = vbcast.lane.b32.xlu0 %v625_v13, 296 }
 0x206   :  { %651 = vbcast.lane.b32.xlu1 %v625_v13, 304  ;;  %655 = vbcast.lane.b32.xlu0 %v625_v13, 312 }
 0x20a   :  { %662 = vbcast.lane.b32.xlu1 %v660_v3, 256  ;;  %666 = vbcast.lane.b32.xlu0 %v660_v3, 264 }
 0x20e   :  { %670 = vbcast.lane.b32.xlu1 %v660_v3, 272  ;;  %674 = vbcast.lane.b32.xlu0 %v660_v3, 280 }
 0x212   :  { %678 = vbcast.lane.b32.xlu1 %v660_v3, 288  ;;  %682 = vbcast.lane.b32.xlu0 %v660_v3, 296 }
 0x216   :  { %686 = vbcast.lane.b32.xlu1 %v660_v3, 304  ;;  %690 = vbcast.lane.b32.xlu0 %v660_v3, 312  ;;  %v759_v3 = vadd.f32 %v1484_v58, %v1730_v29  ;;  %v1746_v29 = vld [vmem:[#allocation18_spill] sm:$0xff] }
 0x24c   :  { %v562_v17 = vpop.permute.xlu1 %561  ;;  %v558_v21 = vpop.permute.xlu0 %557 }
 0x24d   :  { %v806_v32 = vmul.f32 %v742_v51, %v562_v17  ;;  %v807_v7 = vmul.f32 %v743_v34, %v562_v17  ;;  %v804_v54 = vmul.f32 %v740_v30, %v558_v21  ;;  %v805_v53 = vmul.f32 %v741_v22, %v558_v21  ;;  %v1732_v34 = vld [vmem:[#allocation24_spill] sm:$0xff] }
 0x24e   :  { %v764_v51 = vadd.f32 %v1488_v19, %v1731_v12  ;;  %v765_v30 = vadd.f32 %v1488_v19, %v1732_v34  ;;  %v1747_v12 = vld [vmem:[#allocation21_spill] sm:$0xff]  ;;  %v1748_v34 = vld [vmem:[#allocation22_spill] sm:$0xff] }
 0x24f   :  { %870 = vst [vmem:[#allocation5 + $0x10] sm:$0xff] %v806_v32  ;;  %871 = vst [vmem:[#allocation5 + $0x18] sm:$0xff] %v807_v7 }
 0x250   :  { %868 = vst [vmem:[#allocation5] sm:$0xff] %v804_v54  ;;  %869 = vst [vmem:[#allocation5 + $0x8] sm:$0xff] %v805_v53  ;;  %v566_v50 = vpop.permute.xlu1 %565  ;;  %v574_v41 = vpop.permute.xlu0 %573  ;;  %v1733_v53 = vld [vmem:[#allocation15_spill] sm:$0xff] }
 0x251   :  { %v808_v39 = vmul.f32 %v744_v8, %v566_v50  ;;  %v809_v47 = vmul.f32 %v745_v9, %v566_v50  ;;  %v812_v35 = vmul.f32 %v748_v2, %v574_v41  ;;  %v813_v33 = vmul.f32 %v749_v4, %v574_v41  ;;  %v1734_v9 = vld [vmem:[#allocation16_spill] sm:$0xff]  ;;  %v1735_v4 = vld [vmem:[#allocation29_spill] sm:$0xff]  ;;  %v1736_v41 = vld [vmem:[#allocation30_spill] sm:$0xff] }
 0x252   :  { %v762_v8 = vadd.f32 %v1482_v31, %v1733_v53  ;;  %v763_v2 = vadd.f32 %v1482_v31, %v1734_v9  ;;  %v766_v50 = vadd.f32 %v1486_v11, %v1735_v4  ;;  %v1749_v53 = vld [vmem:[#allocation27_spill] sm:$0xff]  ;;  %v1750_v9 = vld [vmem:[#allocation28_spill] sm:$0xff]  ;;  %v1751_v4 = vld [vmem:[#allocation33_spill] sm:$0xff] }
 0x253   :  { %872 = vst [vmem:[#allocation5 + $0x20] sm:$0xff] %v808_v39  ;;  %873 = vst [vmem:[#allocation5 + $0x28] sm:$0xff] %v809_v47  ;;  %v767_v39 = vadd.f32 %v1486_v11, %v1736_v41  ;;  %v1752_v41 = vld [vmem:[#allocation34_spill] sm:$0xff] }
 0x254   :  { %876 = vst [vmem:[#allocation5 + $0x40] sm:$0xff] %v812_v35  ;;  %877 = vst [vmem:[#allocation5 + $0x48] sm:$0xff] %v813_v33  ;;  %v570_v57 = vpop.permute.xlu1 %569  ;;  %v582_v6 = vpop.permute.xlu0 %581 }
 0x255   :  { %v810_v38 = vmul.f32 %v746_v14, %v570_v57  ;;  %v811_v43 = vmul.f32 %v747_v15, %v570_v57  ;;  %v816_v56 = vmul.f32 %v752_v36, %v582_v6  ;;  %v817_v40 = vmul.f32 %v753_v37, %v582_v6  ;;  %v1737_v37 = vld [vmem:[#allocation35_spill] sm:$0xff]  ;;  %v1738_v6 = vld [vmem:[#allocation36_spill] sm:$0xff] }
 0x256   :  { %v768_v57 = vadd.f32 %v1492_v63, %v1737_v37  ;;  %v1753_v37 = vld [vmem:[#allocation39_spill] sm:$0xff] }
 0x257   :  { %874 = vst [vmem:[#allocation5 + $0x30] sm:$0xff] %v810_v38  ;;  %875 = vst [vmem:[#allocation5 + $0x38] sm:$0xff] %v811_v43  ;;  %v769_v38 = vadd.f32 %v1492_v63, %v1738_v6  ;;  %v1739_v43 = vld [vmem:[#allocation41_spill] sm:$0xff]  ;;  %v1754_v6 = vld [vmem:[#allocation40_spill] sm:$0xff] }
 0x258   :  { %880 = vst [vmem:[#allocation5 + $0x60] sm:$0xff] %v816_v56  ;;  %881 = vst [vmem:[#allocation5 + $0x68] sm:$0xff] %v817_v40  ;;  %v578_v42 = vpop.permute.xlu1 %577  ;;  %v593_v52 = vpop.permute.xlu0 %592  ;;  %v770_v56 = vadd.f32 %v1490_v46, %v1739_v43  ;;  %v1740_v40 = vld [vmem:[#allocation42_spill] sm:$0xff]  ;;  %v1755_v43 = vld [vmem:[#allocation43_spill] sm:$0xff] }
 0x259   :  { %v814_v55 = vmul.f32 %v750_v26, %v578_v42  ;;  %v815_v24 = vmul.f32 %v751_v27, %v578_v42  ;;  %v820_v16 = vmul.f32 %v756_v60, %v593_v52  ;;  %v821_v45 = vmul.f32 %v757_v61, %v593_v52 }
 0x25a   :  { %v771_v26 = vadd.f32 %v1490_v46, %v1740_v40  ;;  %v1756_v40 = vld [vmem:[#allocation44_spill] sm:$0xff] }
 0x25b   :  { %878 = vst [vmem:[#allocation5 + $0x50] sm:$0xff] %v814_v55  ;;  %879 = vst [vmem:[#allocation5 + $0x58] sm:$0xff] %v815_v24  ;;  %v1741_v24 = vld [vmem:[#allocation13_spill] sm:$0xff] }
 0x25c   :  { %884 = vst [vmem:[#allocation5 + $0x80] sm:$0xff] %v820_v16  ;;  %885 = vst [vmem:[#allocation5 + $0x88] sm:$0xff] %v821_v45  ;;  %v586_v62 = vpop.permute.xlu1 %585  ;;  %v601_v59 = vpop.permute.xlu0 %600  ;;  %v772_v16 = vadd.f32 %v1478_v18, %v1741_v24  ;;  %v1742_v45 = vld [vmem:[#allocation14_spill] sm:$0xff]  ;;  %v1018_v24 = vld [vmem:[#allocation2 + $0x180] sm:$0xff] }
 0x25d   :  { %v818_v20 = vmul.f32 %v754_v48, %v586_v62  ;;  %v819_v25 = vmul.f32 %v755_v49, %v586_v62  ;;  %v824_v5 = vmul.f32 %v760_v0, %v601_v59  ;;  %v825_v13 = vmul.f32 %v761_v44, %v601_v59  ;;  %v1743_v49 = vld [vmem:[#allocation11_spill] sm:$0xff] }
 0x25e   :  { %v773_v48 = vadd.f32 %v1478_v18, %v1742_v45  ;;  %v774_v0 = vadd.f32 %v1484_v58, %v1743_v49  ;;  %v775_v44 = vadd.f32 %v1484_v58, %v1744_v1  ;;  %v1019_v45 = vld [vmem:[#allocation2 + $0x188] sm:$0xff]  ;;  %v1757_v49 = vld [vmem:[#allocation19_spill] sm:$0xff]  ;;  %v1758_v1 = vld [vmem:[#allocation20_spill] sm:$0xff] }
 0x25f   :  { %882 = vst [vmem:[#allocation5 + $0x70] sm:$0xff] %v818_v20  ;;  %883 = vst [vmem:[#allocation5 + $0x78] sm:$0xff] %v819_v25 }
 0x260   :  { %888 = vst [vmem:[#allocation5 + $0xa0] sm:$0xff] %v824_v5  ;;  %889 = vst [vmem:[#allocation5 + $0xa8] sm:$0xff] %v825_v13  ;;  %v597_v22 = vpop.permute.xlu1 %596  ;;  %v609_v17 = vpop.permute.xlu0 %608 }
 0x261   :  { %v822_v21 = vmul.f32 %v758_v10, %v597_v22  ;;  %v823_v32 = vmul.f32 %v759_v3, %v597_v22  ;;  %v828_v7 = vmul.f32 %v764_v51, %v609_v17  ;;  %v829_v54 = vmul.f32 %v765_v30, %v609_v17 }
 0x262   :  { %v776_v10 = vadd.f32 %v1480_v23, %v1745_v28  ;;  %v777_v3 = vadd.f32 %v1480_v23, %v1746_v29  ;;  %v778_v51 = vadd.f32 %v1482_v31, %v1747_v12  ;;  %v779_v30 = vadd.f32 %v1482_v31, %v1748_v34  ;;  %v1759_v28 = vld [vmem:[#allocation25_spill] sm:$0xff] }
 0x263   :  { %886 = vst [vmem:[#allocation5 + $0x90] sm:$0xff] %v822_v21  ;;  %887 = vst [vmem:[#allocation5 + $0x98] sm:$0xff] %v823_v32 }
 0x264   :  { %892 = vst [vmem:[#allocation5 + $0xc0] sm:$0xff] %v828_v7  ;;  %893 = vst [vmem:[#allocation5 + $0xc8] sm:$0xff] %v829_v54  ;;  %v605_v47 = vpop.permute.xlu1 %604  ;;  %v613_v35 = vpop.permute.xlu0 %612 }
 0x265   :  { %v826_v33 = vmul.f32 %v762_v8, %v605_v47  ;;  %v827_v14 = vmul.f32 %v763_v2, %v605_v47  ;;  %v830_v15 = vmul.f32 %v766_v50, %v613_v35  ;;  %v831_v36 = vmul.f32 %v767_v39, %v613_v35 }
 0x266   :  { %v780_v8 = vadd.f32 %v1488_v19, %v1749_v53  ;;  %v781_v2 = vadd.f32 %v1488_v19, %v1750_v9  ;;  %v782_v50 = vadd.f32 %v1486_v11, %v1751_v4  ;;  %v783_v39 = vadd.f32 %v1486_v11, %v1752_v41 }
 0x267   :  { %890 = vst [vmem:[#allocation5 + $0xb0] sm:$0xff] %v826_v33  ;;  %891 = vst [vmem:[#allocation5 + $0xb8] sm:$0xff] %v827_v14 }
 0x268   :  { %894 = vst [vmem:[#allocation5 + $0xd0] sm:$0xff] %v830_v15  ;;  %895 = vst [vmem:[#allocation5 + $0xd8] sm:$0xff] %v831_v36  ;;  %v617_v27 = vpop.permute.xlu1 %616  ;;  %v621_v60 = vpop.permute.xlu0 %620 }
 0x269   :  { %v832_v61 = vmul.f32 %v768_v57, %v617_v27  ;;  %v833_v42 = vmul.f32 %v769_v38, %v617_v27  ;;  %v834_v52 = vmul.f32 %v770_v56, %v621_v60  ;;  %v835_v55 = vmul.f32 %v771_v26, %v621_v60 }
 0x26a   :  { %v784_v57 = vadd.f32 %v1492_v63, %v1753_v37  ;;  %v785_v38 = vadd.f32 %v1492_v63, %v1754_v6  ;;  %v786_v56 = vadd.f32 %v1490_v46, %v1755_v43  ;;  %v787_v26 = vadd.f32 %v1490_v46, %v1756_v40  ;;  %v1770_v37 = vld [vmem:[#allocation48_spill] sm:$0xff] }
 0x26b   :  { %896 = vst [vmem:[#allocation5 + $0xe0] sm:$0xff] %v832_v61  ;;  %897 = vst [vmem:[#allocation5 + $0xe8] sm:$0xff] %v833_v42 }
 0x26c   :  { %898 = vst [vmem:[#allocation5 + $0xf0] sm:$0xff] %v834_v52  ;;  %899 = vst [vmem:[#allocation5 + $0xf8] sm:$0xff] %v835_v55  ;;  %v628_v62 = vpop.permute.xlu1 %627  ;;  %v632_v59 = vpop.permute.xlu0 %631 }
 0x26d   :  { %v836_v20 = vmul.f32 %v772_v16, %v628_v62  ;;  %v837_v25 = vmul.f32 %v773_v48, %v628_v62  ;;  %v838_v5 = vmul.f32 %v774_v0, %v632_v59  ;;  %v839_v13 = vmul.f32 %v775_v44, %v632_v59 }
 0x26e   :  { %v788_v16 = vadd.f32 %v1018_v24, %v1478_v18  ;;  %v789_v48 = vadd.f32 %v1019_v45, %v1478_v18  ;;  %v790_v0 = vadd.f32 %v1484_v58, %v1757_v49  ;;  %v791_v44 = vadd.f32 %v1484_v58, %v1758_v1  ;;  %v1760_v18 = vld [vmem:[#allocation26_spill] sm:$0xff]  ;;  %v1762_v58 = vld [vmem:[#allocation32_spill] sm:$0xff] }
 0x26f   :  { %900 = vst [vmem:[#allocation5 + $0x100] sm:$0xff] %v836_v20  ;;  %901 = vst [vmem:[#allocation5 + $0x108] sm:$0xff] %v837_v25  ;;  %v793_v29 = vadd.f32 %v1480_v23, %v1760_v18 }
 0x270   :  { %902 = vst [vmem:[#allocation5 + $0x110] sm:$0xff] %v838_v5  ;;  %903 = vst [vmem:[#allocation5 + $0x118] sm:$0xff] %v839_v13  ;;  %v636_v22 = vpop.permute.xlu1 %635  ;;  %v640_v17 = vpop.permute.xlu0 %639 }
 0x271   :  { %v840_v21 = vmul.f32 %v776_v10, %v636_v22  ;;  %v841_v32 = vmul.f32 %v777_v3, %v636_v22  ;;  %v842_v7 = vmul.f32 %v778_v51, %v640_v17  ;;  %v843_v54 = vmul.f32 %v779_v30, %v640_v17  ;;  %v1761_v3 = vld [vmem:[#allocation31_spill] sm:$0xff] }
 0x272   :  { %v792_v10 = vadd.f32 %v1480_v23, %v1759_v28  ;;  %v794_v12 = vadd.f32 %v1482_v31, %v1761_v3  ;;  %v795_v51 = vadd.f32 %v1482_v31, %v1762_v58  ;;  %v1764_v23 = vld [vmem:[#allocation38_spill] sm:$0xff] }
 0x273   :  { %904 = vst [vmem:[#allocation5 + $0x120] sm:$0xff] %v840_v21  ;;  %905 = vst [vmem:[#allocation5 + $0x128] sm:$0xff] %v841_v32  ;;  %v797_v53 = vadd.f32 %v1488_v19, %v1764_v23  ;;  %v1766_v31 = vld [vmem:[#allocation46_spill] sm:$0xff] }
 0x274   :  { %906 = vst [vmem:[#allocation5 + $0x130] sm:$0xff] %v842_v7  ;;  %907 = vst [vmem:[#allocation5 + $0x138] sm:$0xff] %v843_v54  ;;  %v644_v47 = vpop.permute.xlu1 %643  ;;  %v648_v35 = vpop.permute.xlu0 %647  ;;  %v1763_v7 = vld [vmem:[#allocation37_spill] sm:$0xff] }
 0x275   :  { %v844_v33 = vmul.f32 %v780_v8, %v644_v47  ;;  %v845_v14 = vmul.f32 %v781_v2, %v644_v47  ;;  %v846_v15 = vmul.f32 %v782_v50, %v648_v35  ;;  %v847_v36 = vmul.f32 %v783_v39, %v648_v35  ;;  %v1765_v8 = vld [vmem:[#allocation45_spill] sm:$0xff] }
 0x276   :  { %v796_v54 = vadd.f32 %v1488_v19, %v1763_v7  ;;  %v798_v9 = vadd.f32 %v1486_v11, %v1765_v8  ;;  %v799_v2 = vadd.f32 %v1486_v11, %v1766_v31 }
 0x277   :  { %908 = vst [vmem:[#allocation5 + $0x140] sm:$0xff] %v844_v33  ;;  %909 = vst [vmem:[#allocation5 + $0x148] sm:$0xff] %v845_v14  ;;  %v1767_v33 = vld [vmem:[#allocation49_spill] sm:$0xff]  ;;  %v1768_v14 = vld [vmem:[#allocation50_spill] sm:$0xff] }
 0x278   :  { %910 = vst [vmem:[#allocation5 + $0x150] sm:$0xff] %v846_v15  ;;  %911 = vst [vmem:[#allocation5 + $0x158] sm:$0xff] %v847_v36  ;;  %v652_v27 = vpop.permute.xlu1 %651  ;;  %v656_v60 = vpop.permute.xlu0 %655  ;;  %v800_v19 = vadd.f32 %v1492_v63, %v1767_v33  ;;  %v801_v15 = vadd.f32 %v1492_v63, %v1768_v14  ;;  %v1769_v36 = vld [vmem:[#allocation47_spill] sm:$0xff] }
 0x279   :  { %v848_v61 = vmul.f32 %v784_v57, %v652_v27  ;;  %v849_v42 = vmul.f32 %v785_v38, %v652_v27  ;;  %v850_v52 = vmul.f32 %v786_v56, %v656_v60  ;;  %v851_v55 = vmul.f32 %v787_v26, %v656_v60 }
 0x27a   :  { %v802_v11 = vadd.f32 %v1490_v46, %v1769_v36  ;;  %v803_v57 = vadd.f32 %v1490_v46, %v1770_v37 }
 0x27b   :  { %912 = vst [vmem:[#allocation5 + $0x160] sm:$0xff] %v848_v61  ;;  %913 = vst [vmem:[#allocation5 + $0x168] sm:$0xff] %v849_v42 }
 0x27c   :  { %914 = vst [vmem:[#allocation5 + $0x170] sm:$0xff] %v850_v52  ;;  %915 = vst [vmem:[#allocation5 + $0x178] sm:$0xff] %v851_v55  ;;  %v663_v62 = vpop.permute.xlu1 %662  ;;  %v667_v59 = vpop.permute.xlu0 %666 }
 0x27d   :  { %v852_v20 = vmul.f32 %v788_v16, %v663_v62  ;;  %v853_v25 = vmul.f32 %v789_v48, %v663_v62  ;;  %v854_v5 = vmul.f32 %v790_v0, %v667_v59  ;;  %v855_v13 = vmul.f32 %v791_v44, %v667_v59 }
 0x27f   :  { %916 = vst [vmem:[#allocation5 + $0x180] sm:$0xff] %v852_v20  ;;  %917 = vst [vmem:[#allocation5 + $0x188] sm:$0xff] %v853_v25 }
 0x280   :  { %918 = vst [vmem:[#allocation5 + $0x190] sm:$0xff] %v854_v5  ;;  %919 = vst [vmem:[#allocation5 + $0x198] sm:$0xff] %v855_v13  ;;  %v671_v34 = vpop.permute.xlu1 %670  ;;  %v675_v30 = vpop.permute.xlu0 %674 }
 0x281   :  { %v856_v22 = vmul.f32 %v792_v10, %v671_v34  ;;  %v857_v17 = vmul.f32 %v793_v29, %v671_v34  ;;  %v858_v21 = vmul.f32 %v794_v12, %v675_v30  ;;  %v859_v32 = vmul.f32 %v795_v51, %v675_v30 }
 0x283   :  { %920 = vst [vmem:[#allocation5 + $0x1a0] sm:$0xff] %v856_v22  ;;  %921 = vst [vmem:[#allocation5 + $0x1a8] sm:$0xff] %v857_v17 }
 0x284   :  { %922 = vst [vmem:[#allocation5 + $0x1b0] sm:$0xff] %v858_v21  ;;  %923 = vst [vmem:[#allocation5 + $0x1b8] sm:$0xff] %v859_v32  ;;  %v679_v4 = vpop.permute.xlu1 %678  ;;  %v683_v50 = vpop.permute.xlu0 %682 }
 0x285   :  { %v860_v41 = vmul.f32 %v796_v54, %v679_v4  ;;  %v861_v39 = vmul.f32 %v797_v53, %v679_v4  ;;  %v862_v47 = vmul.f32 %v798_v9, %v683_v50  ;;  %v863_v35 = vmul.f32 %v799_v2, %v683_v50 }
 0x287   :  { %924 = vst [vmem:[#allocation5 + $0x1c0] sm:$0xff] %v860_v41  ;;  %925 = vst [vmem:[#allocation5 + $0x1c8] sm:$0xff] %v861_v39 }
 0x288   :  { %926 = vst [vmem:[#allocation5 + $0x1d0] sm:$0xff] %v862_v47  ;;  %927 = vst [vmem:[#allocation5 + $0x1d8] sm:$0xff] %v863_v35  ;;  %v687_v6 = vpop.permute.xlu1 %686  ;;  %v691_v38 = vpop.permute.xlu0 %690 }
 0x289   :  { %v864_v43 = vmul.f32 %v800_v19, %v687_v6  ;;  %v865_v56 = vmul.f32 %v801_v15, %v687_v6  ;;  %v866_v40 = vmul.f32 %v802_v11, %v691_v38  ;;  %v867_v26 = vmul.f32 %v803_v57, %v691_v38 }
 0x28b   :  { %928 = vst [vmem:[#allocation5 + $0x1e0] sm:$0xff] %v864_v43  ;;  %929 = vst [vmem:[#allocation5 + $0x1e8] sm:$0xff] %v865_v56 }
 0x28c   :  { %930 = vst [vmem:[#allocation5 + $0x1f0] sm:$0xff] %v866_v40  ;;  %931 = vst [vmem:[#allocation5 + $0x1f8] sm:$0xff] %v867_v26 }
 0x28d   :  { %1053 = shalt.err (!%p1050_p12)
}
 0x28e   :  { %s1054_s13 = scalar_lea.hbm %s1639_s4, 8192 }
 0x28f   :  { %p1055_p13 = scmp.ne.s32.totalorder %s1639_s4, %s1054_s13  ;;  %p1058_p0 = scmp.lt.u32.totalorder %s1054_s13, %s1639_s4 }
 0x291   :  { %p1060_p1 = pnand %p1058_p0, %p1055_p13 }
 0x293   :  { %1063 = shalt.err (!%p1060_p1)
}
 0x294   :  { %943 = dma.vmem_to_hbm [thread:$0]  %s938_s3, 8192, %s1639_s4, [#allocation4], %s1069_s25, %s1069_s25, %s1070_s26  }
 0x295   :  { %1066 = dma.done.wait [#allocation4], 8192  }
 0x296   :  { %1067 = vsyncadd [#allocation4], 4294959104 }
 0x297   :  { %947 = vsyncpa [#allocation3], 1 }
 0x298   :  { %948 = vsyncpa [#allocation4], 1 }

</bundles_post_ra>
